<compile_context>
chip_gen: v5e
topology: v5e:2x2
jax: 0.10.0
libtpu: 0.0.40
codegen_flags: <defaults>
</compile_context>

<pallas_src>
import functools

import numpy as np
import jax
import jax.numpy as jnp
from jax.experimental import pallas as pl
from jax.experimental.pallas import tpu as pltpu


_LANE = 128
_SUBLANE = 8
_VMEM_LIMIT_BYTES = 40 * 1024 * 1024   # safe on v5e/v6e (128 MiB) and v7x (64 MiB)
_TILE_BUDGET_BYTES = 16 * 1024 * 1024  # budget for double-buffered row tiles
_NEG_LARGE = float(jnp.finfo(jnp.float32).min)


def _round_up(a, b):
    return (a + b - 1) // b * b


def _pad2d(a, rows, cols):
    pr = rows - a.shape[0]
    pc = cols - a.shape[1]
    if pr or pc:
        a = jnp.pad(a, ((0, pr), (0, pc)))
    return a


def _pick_tm(n, per_row_bytes):
    """Row-tile size: multiple of 8, <=512, double-buffered tiles under budget."""
    tm = max(_SUBLANE, _TILE_BUDGET_BYTES // max(2 * per_row_bytes, 1))
    tm = min(tm, 512)
    tm = min(tm, _round_up(n, _SUBLANE))
    tm = max(_SUBLANE, (tm // _SUBLANE) * _SUBLANE)
    return tm


# ---------------------------------------------------------------------------
# Kernels
# ---------------------------------------------------------------------------

def _fused_heads_kernel(x_ref, w_ref, b_ref, y_ref):
    """y = x @ [Wc | Wb] + [bc | bb]  (single lane-dense MXU matmul per tile)."""
    acc = jnp.dot(x_ref[...], w_ref[...], preferred_element_type=jnp.float32)
    y_ref[...] = (acc + b_ref[...]).astype(y_ref.dtype)


def _fused_heads_attr_kernel(x_ref, w_ref, b_ref, w1x_ref, embp_ref, b1_ref,
                             w2_ref, b2_ref, y_ref, attr_ref, *, num_scores):
    """Fused: scores/deltas + attribute MLP, x read from HBM once per tile."""
    x = x_ref[...]

    # Combined scores|deltas matmul (lane-dense, padded output width).
    y = jnp.dot(x, w_ref[...], preferred_element_type=jnp.float32) + b_ref[...]
    y_ref[...] = y.astype(y_ref.dtype)

    # argmax over the (unpadded) score columns, first-max tie-break like torch.max.
    kpad = y.shape[-1]
    cols = jax.lax.broadcasted_iota(jnp.int32, y.shape, 1)
    colsf = cols.astype(jnp.float32)
    masked = jnp.where(cols < num_scores, y, _NEG_LARGE)
    row_max = jnp.max(masked, axis=-1, keepdims=True)
    first_idx = jnp.min(jnp.where(masked >= row_max, colsf, float(kpad)),
                        axis=-1, keepdims=True)
    onehot = (colsf == first_idx).astype(jnp.float32)

    # h = relu(x @ W1_x + onehot @ (E @ W1_e) + b1)   (xcat never materialized)
    h = jnp.dot(x, w1x_ref[...], preferred_element_type=jnp.float32)
    h = h + jnp.dot(onehot, embp_ref[...], preferred_element_type=jnp.float32)
    h = jnp.maximum(h + b1_ref[...], 0.0)

    attr = jnp.dot(h.astype(jnp.bfloat16), w2_ref[...],
                   preferred_element_type=jnp.float32)
    attr_ref[...] = (attr + b2_ref[...]).astype(attr_ref.dtype)


# ---------------------------------------------------------------------------
# pallas_call wrappers
# ---------------------------------------------------------------------------

def _run_fused_heads(x_pad, w, b, tm):
    n_pad, d = x_pad.shape
    kpad = w.shape[1]
    return pl.pallas_call(
        _fused_heads_kernel,
        out_shape=jax.ShapeDtypeStruct((n_pad, kpad), jnp.float32),
        grid=(n_pad // tm,),
        in_specs=[
            pl.BlockSpec((tm, d), lambda i: (i, 0)),      # row-tiled x
            pl.BlockSpec((d, kpad), lambda i: (0, 0)),    # resident weights
            pl.BlockSpec((1, kpad), lambda i: (0, 0)),    # resident bias
        ],
        out_specs=pl.BlockSpec((tm, kpad), lambda i: (i, 0)),
        compiler_params=pltpu.CompilerParams(
            dimension_semantics=("parallel",),
            vmem_limit_bytes=_VMEM_LIMIT_BYTES),
    )(x_pad, w, b)


def _run_fused_heads_attr(x_pad, wcb, bcb, w1x, embp, b1, w2, b2, tm, num_scores):
    n_pad, d = x_pad.shape
    kpad = wcb.shape[1]
    hpad = w1x.shape[1]
    apad = w2.shape[1]
    kernel = functools.partial(_fused_heads_attr_kernel, num_scores=num_scores)
    return pl.pallas_call(
        kernel,
        out_shape=(jax.ShapeDtypeStruct((n_pad, kpad), jnp.float32),
                   jax.ShapeDtypeStruct((n_pad, apad), jnp.float32)),
        grid=(n_pad // tm,),
        in_specs=[
            pl.BlockSpec((tm, d), lambda i: (i, 0)),        # row-tiled x
            pl.BlockSpec((d, kpad), lambda i: (0, 0)),      # [Wc|Wb]
            pl.BlockSpec((1, kpad), lambda i: (0, 0)),      # [bc|bb]
            pl.BlockSpec((d, hpad), lambda i: (0, 0)),      # W1_x
            pl.BlockSpec((kpad, hpad), lambda i: (0, 0)),   # E @ W1_e (padded)
            pl.BlockSpec((1, hpad), lambda i: (0, 0)),      # b1
            pl.BlockSpec((hpad, apad), lambda i: (0, 0)),   # W2
            pl.BlockSpec((1, apad), lambda i: (0, 0)),      # b2
        ],
        out_specs=(pl.BlockSpec((tm, kpad), lambda i: (i, 0)),
                   pl.BlockSpec((tm, apad), lambda i: (i, 0))),
        compiler_params=pltpu.CompilerParams(
            dimension_semantics=("parallel",),
            vmem_limit_bytes=_VMEM_LIMIT_BYTES),
    )(x_pad, wcb, bcb, w1x, embp, b1, w2, b2)


# ---------------------------------------------------------------------------
# Module wrapper (parameter setup + padding / slicing glue)
# ---------------------------------------------------------------------------

class FastRCNNOutputLayersPallas:
    def __init__(self, input_size, num_classes, cls_agnostic_bbox_reg,
                 box_dim=4, use_attr=False, num_attrs=-1, *,
                 key=jax.random.PRNGKey(0)):
        if not isinstance(input_size, int):
            input_size = int(np.prod(input_size))
        self.input_size = input_size
        self.use_attr = use_attr
        self.num_scores = num_classes + 1
        num_bbox_reg_classes = 1 if cls_agnostic_bbox_reg else num_classes
        self.num_deltas = num_bbox_reg_classes * box_dim

        d = input_size
        k = jax.random.split(key, 5)

        # cls_score: weight ~ N(0, 0.01), bias 0; bbox_pred: weight ~ N(0, 0.001).
        # Stored transposed (in, out), so y = x @ W + b == PyTorch x @ W.T + b.
        self.wc = (0.01 * jax.random.normal(k[0], (d, self.num_scores))).astype(jnp.float32)
        self.bc = jnp.zeros((self.num_scores,), jnp.float32)
        self.wb = (0.001 * jax.random.normal(k[1], (d, self.num_deltas))).astype(jnp.float32)
        self.bb = jnp.zeros((self.num_deltas,), jnp.float32)

        # Fused lane-dense weight [Wc | Wb], padded to multiple of 128 output lanes.
        kcomb = self.num_scores + self.num_deltas
        self.kpad = _round_up(kcomb, _LANE)
        wcb = jnp.concatenate([self.wc, self.wb], axis=1)
        self.wcb_p = _pad2d(wcb, d, self.kpad).astype(jnp.bfloat16)
        self.bcb_p = _pad2d(jnp.concatenate([self.bc, self.bb])[None, :], 1, self.kpad)

        if use_attr:
            emb_dim = d // 8
            hid = d // 4
            self.num_attr_out = num_attrs + 1
            # nn.Embedding default init: N(0, 1); fc_attr/attr_score: synthetic init.
            self.cls_embedding = jax.random.normal(
                k[2], (self.num_scores, emb_dim)).astype(jnp.float32)
            self.w1 = (0.05 * jax.random.normal(k[3], (d + emb_dim, hid))).astype(jnp.float32)
            self.b1 = jnp.zeros((hid,), jnp.float32)
            self.w2 = (0.05 * jax.random.normal(k[4], (hid, self.num_attr_out))).astype(jnp.float32)
            self.b2 = jnp.zeros((self.num_attr_out,), jnp.float32)

            self.hpad = _round_up(hid, _LANE)
            self.apad = _round_up(self.num_attr_out, _LANE)
            # Split W1 by rows: [x, cls_emb] @ W1 == x @ W1_x + cls_emb @ W1_e.
            self.w1x_p = _pad2d(self.w1[:d], d, self.hpad).astype(jnp.bfloat16)
            # Fold the embedding lookup into a tiny projected table so the kernel
            # does onehot(argmax) @ (E @ W1_e) on the MXU instead of a gather.
            embp = jnp.dot(self.cls_embedding.astype(jnp.bfloat16),
                           self.w1[d:].astype(jnp.bfloat16),
                           preferred_element_type=jnp.float32)
            self.embp_p = _pad2d(embp, self.kpad, self.hpad)
            self.b1_p = _pad2d(self.b1[None, :], 1, self.hpad)
            self.w2_p = _pad2d(self.w2, self.hpad, self.apad).astype(jnp.bfloat16)
            self.b2_p = _pad2d(self.b2[None, :], 1, self.apad)

    def __call__(self, x):
        if x.ndim > 2:
            x = x.reshape(x.shape[0], -1)       # torch.flatten(x, start_dim=1)
        n, d = x.shape
        x = x.astype(jnp.bfloat16)

        if not self.use_attr:
            per_row = 2 * d + 4 * self.kpad                   # bf16 x + f32 out
            tm = _pick_tm(n, per_row)
            n_pad = _round_up(n, tm)
            x_p = _pad2d(x, n_pad, d)
            y = _run_fused_heads(x_p, self.wcb_p, self.bcb_p, tm)
            scores = y[:n, :self.num_scores]
            deltas = y[:n, self.num_scores:self.num_scores + self.num_deltas]
            return scores, deltas

        per_row = 2 * d + 4 * (self.kpad + self.apad)
        tm = _pick_tm(n, per_row)
        n_pad = _round_up(n, tm)
        x_p = _pad2d(x, n_pad, d)
        y, attr = _run_fused_heads_attr(
            x_p, self.wcb_p, self.bcb_p, self.w1x_p, self.embp_p,
            self.b1_p, self.w2_p, self.b2_p, tm, self.num_scores)
        scores = y[:n, :self.num_scores]
        deltas = y[:n, self.num_scores:self.num_scores + self.num_deltas]
        attr_scores = attr[:n, :self.num_attr_out]
        return scores, attr_scores, deltas


# ---------------------------------------------------------------------------
# Pure-JAX reference (mirrors the kernel's bf16-input / f32-accum precision)
# ---------------------------------------------------------------------------

def _reference(model, x):
    if x.ndim > 2:
        x = x.reshape(x.shape[0], -1)
    xb = x.astype(jnp.bfloat16)
    scores = jnp.dot(xb, model.wc.astype(jnp.bfloat16),
                     preferred_element_type=jnp.float32) + model.bc
    deltas = jnp.dot(xb, model.wb.astype(jnp.bfloat16),
                     preferred_element_type=jnp.float32) + model.bb
    if model.use_attr:
        max_class = jnp.argmax(scores, axis=-1)
        cls_emb = jnp.take(model.cls_embedding, max_class, axis=0)
        xcat = jnp.concatenate([x.astype(jnp.float32), cls_emb], axis=-1)
        h = jnp.dot(xcat.astype(jnp.bfloat16), model.w1.astype(jnp.bfloat16),
                    preferred_element_type=jnp.float32) + model.b1
        h = jnp.maximum(h, 0.0)
        attr = jnp.dot(h.astype(jnp.bfloat16), model.w2.astype(jnp.bfloat16),
                       preferred_element_type=jnp.float32) + model.b2
        return scores, attr, deltas
    return scores, deltas


if __name__ == "__main__":
    key = jax.random.PRNGKey(0)
    kx, kparam = jax.random.split(key)

    # Small, module-consistent shapes: 16 proposals of pooled NCHW features
    # (2, 4, 4) -> flattened input_size = 32.
    N, C, H, W = 16, 2, 4, 4
    num_classes = 8
    num_attrs = 15
    x = jax.random.normal(kx, (N, C, H, W), dtype=jnp.float32)

    # Path 1: plain (scores, proposal_deltas)
    model = FastRCNNOutputLayersPallas(
        input_size=(C, H, W), num_classes=num_classes,
        cls_agnostic_bbox_reg=False, box_dim=4, use_attr=False, key=kparam)
    scores, deltas = model(x)
    jax.block_until_ready((scores, deltas))
    ref_scores, ref_deltas = _reference(model, x)
    assert scores.shape == (N, num_classes + 1)
    assert deltas.shape == (N, num_classes * 4)
    assert jnp.allclose(scores, ref_scores, atol=1e-4, rtol=1e-3)
    assert jnp.allclose(deltas, ref_deltas, atol=1e-4, rtol=1e-3)

    # Path 2: with attribute head (scores, attr_scores, proposal_deltas)
    model_attr = FastRCNNOutputLayersPallas(
        input_size=(C, H, W), num_classes=num_classes,
        cls_agnostic_bbox_reg=False, box_dim=4,
        use_attr=True, num_attrs=num_attrs, key=kparam)
    scores_a, attr_scores, deltas_a = model_attr(x)
    jax.block_until_ready((scores_a, attr_scores, deltas_a))
    r_scores, r_attr, r_deltas = _reference(model_attr, x)
    assert attr_scores.shape == (N, num_attrs + 1)
    assert jnp.allclose(scores_a, r_scores, atol=1e-4, rtol=1e-3)
    assert jnp.allclose(attr_scores, r_attr, atol=1e-3, rtol=1e-3)
    assert jnp.allclose(deltas_a, r_deltas, atol=1e-4, rtol=1e-3)

    print("KERNEL_OK")
</pallas_src>

<mosaic_0001>
module attributes {stable_mosaic.version = 11 : i64} {
  func.func @_fused_heads_kernel(%arg0: i32, %arg1: memref<16x32xbf16, #tpu.memory_space<vmem>>, %arg2: memref<32x128xbf16, #tpu.memory_space<vmem>>, %arg3: memref<1x128xf32, #tpu.memory_space<vmem>>, %arg4: memref<16x128xf32, #tpu.memory_space<vmem>>) attributes {dimension_semantics = [#tpu.dimension_semantics<parallel>], iteration_bounds = array<i64: 1>, scalar_prefetch = 0 : i64, scratch_operands = 0 : i64, tpu.core_type = #tpu.core_type<tc>, window_params = [{transform_indices = @transform_0, window_bounds = array<i64: 16, 32>}, {pipeline_mode = #tpu.pipeline_mode<synchronous>, transform_indices = @transform_1, window_bounds = array<i64: 32, 128>}, {pipeline_mode = #tpu.pipeline_mode<synchronous>, transform_indices = @transform_2, window_bounds = array<i64: 1, 128>}, {transform_indices = @transform_3, window_bounds = array<i64: 16, 128>}]} {
    %c0 = arith.constant 0 : index
    %c0_0 = arith.constant 0 : index
    %0 = vector.load %arg1[%c0, %c0_0] : memref<16x32xbf16, #tpu.memory_space<vmem>>, vector<16x32xbf16>
    %c0_1 = arith.constant 0 : index
    %c0_2 = arith.constant 0 : index
    %1 = vector.load %arg2[%c0_1, %c0_2] : memref<32x128xbf16, #tpu.memory_space<vmem>>, vector<32x128xbf16>
    %cst = arith.constant dense<0.000000e+00> : vector<16x128xf32>
    %2 = tpu.matmul %0, %1, %cst {dimension_numbers = #tpu.dot_dimension_numbers<[1], [0], [0], [1], [0, 0, 1, 1], [], []>} : vector<16x32xbf16>, vector<32x128xbf16>, vector<16x128xf32> -> vector<16x128xf32>
    %c0_3 = arith.constant 0 : index
    %c0_4 = arith.constant 0 : index
    %3 = vector.load %arg3[%c0_3, %c0_4] : memref<1x128xf32, #tpu.memory_space<vmem>>, vector<1x128xf32>
    %4 = vector.broadcast %3 : vector<1x128xf32> to vector<16x128xf32>
    %5 = arith.addf %2, %4 : vector<16x128xf32>
    %c0_5 = arith.constant 0 : index
    %c0_6 = arith.constant 0 : index
    %6 = vector.load %arg4[%c0_5, %c0_6] : memref<16x128xf32, #tpu.memory_space<vmem>>, vector<16x128xf32>
    tpu.vector_store %arg4[%c0_5, %c0_6], %5 {strides = array<i32>} : memref<16x128xf32, #tpu.memory_space<vmem>>, vector<16x128xf32>,
    return
  }
  func.func @transform_0(%arg0: i32) -> (i32, i32) {
    %c0_i32 = arith.constant 0 : i32
    %c0_i32_0 = arith.constant 0 : i32
    return %arg0, %c0_i32 : i32, i32
  }
  func.func @transform_1(%arg0: i32) -> (i32, i32) {
    %c0_i32 = arith.constant 0 : i32
    %c0_i32_0 = arith.constant 0 : i32
    %c0_i32_1 = arith.constant 0 : i32
    return %c0_i32, %c0_i32_0 : i32, i32
  }
  func.func @transform_2(%arg0: i32) -> (i32, i32) {
    %c0_i32 = arith.constant 0 : i32
    %c0_i32_0 = arith.constant 0 : i32
    %c0_i32_1 = arith.constant 0 : i32
    return %c0_i32, %c0_i32_0 : i32, i32
  }
  func.func @transform_3(%arg0: i32) -> (i32, i32) {
    %c0_i32 = arith.constant 0 : i32
    %c0_i32_0 = arith.constant 0 : i32
    return %arg0, %c0_i32 : i32, i32
  }
}

</mosaic_0001>

<bundles_post_ra>
// kernel: tpu_custom_call.1
= control target key start
LH: loop header
LB: loop body
LE: loop exit
PB: predicated region body
PF: predicated region fallthrough
CT: control target
= control target key end

     0   :  { %8 = vsyncpa [#allocation3], 0  ;;  %s256_s0 = inlined_call_operand.hbm [shape: bf16[16,32], index: 0, kind: input, shape index: {}]   ;;  %s257_s1 = inlined_call_operand.hbm [shape: bf16[32,128], index: 1, kind: input, shape index: {}]   ;;  %s258_s2 = inlined_call_operand.vmem [shape: f32[1,128], index: 2, kind: input, shape index: {}]   ;;  %s259_s3 = inlined_call_operand.hbm [shape: f32[16,128], index: 3, kind: output, shape index: {}]  }
   0x1   :  { %9 = vsyncpa [#allocation6], 0 }
   0x2   :  { %10 = vsyncpa [#allocation4], 0  ;;  %s15_s14 = sshll.u32 %s256_s0, 4  ;;  %s217_s15 = smov [#allocation2]   ;;  %s16_s14 = int_to_ptr.hbm [resolvable:$true] %s15_s14 }
   0x3   :  { %s17_s16 = sshll.u32 %s217_s15, 4  ;;  %s28_s19 = sshll.u32 %s257_s1, 4  ;;  %s18_s16 = int_to_ptr.vmem [resolvable:$true] %s17_s16  ;;  %s29_s19 = int_to_ptr.hbm [resolvable:$true] %s28_s19 }
   0x4   :  { %s218_s20 = smov 64   ;;  %s219_s21 = smov 4  }
   0x5   :  { %23 = dma.hbm_to_vmem [thread:$0]  %s16_s14, 128, %s18_s16, [#allocation3], %s218_s20, %s218_s20, %s219_s21  }
   0x6   :  { %s220_s22 = smov [#allocation5]  }
   0x7   :  { %s30_s23 = sshll.u32 %s220_s22, 4  ;;  %s31_s23 = int_to_ptr.vmem [resolvable:$true] %s30_s23 }
   0x8   :  { %36 = dma.hbm_to_vmem [thread:$0]  %s29_s19, 256, %s31_s23, [#allocation6], %s218_s20, %s218_s20, %s219_s21  }
   0x9   :  { %211 = dma.done.wait [#allocation3], 128  }
   0xa   :  { %212 = vsyncadd [#allocation3], 4294967168 }
   0xb   :  { %213 = dma.done.wait [#allocation6], 256  }
   0xc   :  { %214 = vsyncadd [#allocation6], 4294967040  ;;  %v130_v0 = vld [vmem:[#allocation5 + $0x8] sm:$0xff]  ;;  %v129_v1 = vld [vmem:[#allocation5] sm:$0xff]  ;;  %vm75_vm0 = vcmask 261120   ;;  %s221_s24 = smov [#allocation7]  }
   0xd   :  { %85 = vmatpush.bf16.msra.mxu0 %v130_v0  ;;  %v128_v2 = vld [vmem:[#allocation2] sm:$0xff]  ;;  %s99_s25 = sshll.u32 %s221_s24, 4  ;;  %s101_s28 = sshll.u32 %s259_s3, 4  ;;  %s100_s25 = int_to_ptr.vmem [resolvable:$true] %s99_s25  ;;  %s102_s28 = int_to_ptr.hbm [resolvable:$true] %s101_s28 }
   0xe   :  { %v138_v3 = vld [vmem:[%s258_s2] ss:$0 sm:$0xff]  ;;  %s222_s29 = smov 128   ;;  %s223_s30 = smov 8  }
  0x11   :  { %86 = vmatpush.bf16.msra.mxu0 %v129_v1 }
  0x14   :  { %127 = vmatmul.msk.bf16.vlgmr.msra.gmra.mxu0 %vm75_vm0, %v128_v2 }
  0x91   :  { %v88_v4 = vpop.f32.mrf.mxu0 }
  0x92   :  { %v89_v5 = vadd.f32 %v138_v3, %v88_v4 }
  0x94   :  { %93 = vst [vmem:[#allocation7] sm:$0xff] %v89_v5 }
  0x99   :  { %v90_v6 = vpop.f32.mrf.mxu0 }
  0x9a   :  { %v91_v7 = vadd.f32 %v138_v3, %v90_v6 }
  0x9c   :  { %94 = vst [vmem:[#allocation7 + $0x8] sm:$0xff] %v91_v7 }
  0x9d   :  { %107 = dma.vmem_to_hbm [thread:$0]  %s100_s25, 256, %s102_s28, [#allocation4], %s222_s29, %s222_s29, %s223_s30  }
  0x9e   :  { %215 = dma.done.wait [#allocation4], 256  }
  0x9f   :  { %216 = vsyncadd [#allocation4], 4294967040 }
  0xa0   :  { %112 = vsyncpa [#allocation3], 1 }
  0xa1   :  { %113 = vsyncpa [#allocation6], 1 }
  0xa2   :  { %114 = vsyncpa [#allocation4], 1 }

</bundles_post_ra>
